<compile_context>
chip_gen: v7x
topology: tpu7x:2x2x1
jax: 0.10.0
libtpu: 0.0.40
codegen_flags: <defaults>
</compile_context>

<pallas_src>
import functools
import math

import jax
import jax.numpy as jnp
from jax import lax
from jax.experimental import pallas as pl
from jax.experimental.pallas import tpu as pltpu

LANES = 512                  # lane-dense last dim (multiple of 128)
MAX_TILE_ROWS = 2048         # 2048 x 512 x 4B = 4 MiB f32 per input block
ALIGN = 8 * LANES            # keeps the row count a multiple of 8


def _ohem_kernel(x_ref, y_ref, sum_ref, cnt_ref, *,
                 thresh, greater, tile_rows, cols, num_blocks,
                 tail_rows, tail_cols, has_tail):
    i = pl.program_id(0)

    @pl.when(i == 0)
    def _():
        sum_ref[...] = jnp.zeros_like(sum_ref)
        cnt_ref[...] = jnp.zeros_like(cnt_ref)

    x = x_ref[...].astype(jnp.float32)
    y = y_ref[...].astype(jnp.float32)

    # BCEWithLogitsLoss(reduction='none'):
    #   loss = max(x, 0) - x*y + log(1 + exp(-|x|))
    loss = jnp.maximum(x, 0.0) - x * y + jnp.log1p(jnp.exp(-jnp.abs(x)))
    hard = (loss > thresh) if greater else (loss < thresh)

    def _accumulate(sel):
        masked = jnp.where(sel, loss, 0.0)
        cntf = sel.astype(jnp.float32)
        # Sublane-group partial reduction: the reshape only splits the major
        # dim (keeps the (8, cols) tile layout), so the axis-0 sums lower to
        # plain VALU adds -- no per-iteration cross-lane XLU reduce.
        sum_ref[...] += masked.reshape(tile_rows // 8, 8, cols).sum(axis=0)
        cnt_ref[...] += cntf.reshape(tile_rows // 8, 8, cols).sum(axis=0)

    if not has_tail:
        # Common path: every block is fully valid -> no mask work at all.
        _accumulate(hard)
    else:
        if num_blocks > 1:
            @pl.when(i < num_blocks - 1)
            def _():
                _accumulate(hard)

        @pl.when(i == num_blocks - 1)
        def _():
            # Only the single tail block pays for the validity mask.  The
            # bounds are small static Python ints, so no per-element global
            # index math and no int32 overflow for huge inputs.
            row = lax.broadcasted_iota(jnp.int32, loss.shape, 0)
            col = lax.broadcasted_iota(jnp.int32, loss.shape, 1)
            valid = (row < tail_rows) | ((row == tail_rows) & (col < tail_cols))
            _accumulate(jnp.logical_and(hard, valid))


def ohem_ce_loss(logits, labels, *, thresh=0.7, greater=True):
    """Pallas implementation of OhemCELoss.forward (`thresh` is a probability)."""
    thresh_val = -math.log(float(thresh))

    n = logits.size
    n_min = n // 16

    x = logits.reshape(-1)
    y = labels.reshape(-1)

    # Pad only when the flat size is not already a multiple of 8*LANES.
    # (Aligned sizes -- the common image-tensor case -- need no copy at all.)
    n_pad = ((n + ALIGN - 1) // ALIGN) * ALIGN
    pad = n_pad - n
    if pad:
        x = jnp.pad(x, (0, pad))
        y = jnp.pad(y, (0, pad))

    rows = n_pad // LANES                        # multiple of 8
    x2 = x.reshape(rows, LANES)
    y2 = y.reshape(rows, LANES)

    tile_rows = min(MAX_TILE_ROWS, rows)         # multiple of 8
    num_blocks = pl.cdiv(rows, tile_rows)

    # Static tail geometry: the last block may cover pad zeros and/or the
    # ragged block overhang; every element with flat index < n is valid.
    tile_elems = tile_rows * LANES
    tail_valid = n - (num_blocks - 1) * tile_elems
    has_tail = tail_valid < tile_elems
    tail_rows = tail_valid // LANES
    tail_cols = tail_valid % LANES

    kernel = functools.partial(
        _ohem_kernel, thresh=thresh_val, greater=greater,
        tile_rows=tile_rows, cols=LANES, num_blocks=num_blocks,
        tail_rows=tail_rows, tail_cols=tail_cols, has_tail=has_tail)

    # Double-buffered inputs + accumulators + headroom; capped for v7x's 64 MiB VMEM.
    in_bytes = tile_rows * LANES * (x2.dtype.itemsize + y2.dtype.itemsize)
    vmem_limit = int(min(48 << 20, max(32 << 20, 2 * in_bytes + (8 << 20))))

    sum_part, cnt_part = pl.pallas_call(
        kernel,
        out_shape=(
            jax.ShapeDtypeStruct((8, LANES), jnp.float32),
            jax.ShapeDtypeStruct((8, LANES), jnp.float32),
        ),
        grid_spec=pltpu.PrefetchScalarGridSpec(
            num_scalar_prefetch=0,
            grid=(num_blocks,),
            in_specs=[
                pl.BlockSpec((tile_rows, LANES), lambda i: (i, 0)),
                pl.BlockSpec((tile_rows, LANES), lambda i: (i, 0)),
            ],
            out_specs=[
                pl.BlockSpec((8, LANES), lambda i: (0, 0)),
                pl.BlockSpec((8, LANES), lambda i: (0, 0)),
            ],
        ),
        compiler_params=pltpu.CompilerParams(
            dimension_semantics=("arbitrary",),
            vmem_limit_bytes=vmem_limit),
    )(x2, y2)

    hard_sum = jnp.sum(sum_part)
    hard_cnt = jnp.sum(cnt_part)
    # NaN iff there are no hard elements AND n_min == 0 (matches torch.mean of empty).
    mean_hard = hard_sum / hard_cnt

    if n_min == 0:
        # loss_hard.numel() < 0 is never true in PyTorch -> always the masked mean.
        return mean_hard

    def _fallback():
        # Rare path (fewer than n_min hard elements): recompute the elementwise
        # loss in plain JAX and take the mean of the top-k values.  Only
        # executed when the predicate is true thanks to lax.cond.
        xf = logits.reshape(-1).astype(jnp.float32)
        yf = labels.reshape(-1).astype(jnp.float32)
        loss = jnp.maximum(xf, 0.0) - xf * yf + jnp.log1p(jnp.exp(-jnp.abs(xf)))
        return jnp.mean(lax.top_k(loss, n_min)[0])

    return lax.cond(hard_cnt < n_min, _fallback, lambda: mean_hard)


def _reference(logits, labels, *, thresh=0.7, greater=True):
    """Pure-JAX reference mirroring the PyTorch module."""
    t = -math.log(float(thresh))
    x = logits.reshape(-1).astype(jnp.float32)
    y = labels.reshape(-1).astype(jnp.float32)
    loss = jnp.maximum(x, 0.0) - x * y + jnp.log1p(jnp.exp(-jnp.abs(x)))
    n_min = loss.size // 16
    mask = (loss > t) if greater else (loss < t)
    cnt = jnp.sum(mask)
    masked_mean = jnp.sum(jnp.where(mask, loss, 0.0)) / cnt.astype(jnp.float32)
    if n_min == 0:
        return masked_mean
    topk_mean = jnp.mean(lax.top_k(loss, n_min)[0])
    return jnp.where(cnt < n_min, topk_mean, masked_mean)


if __name__ == "__main__":
    key = jax.random.PRNGKey(0)
    k1, k2 = jax.random.split(key)

    # Small shapes consistent with the module: logits/labels [N, C, H, W].
    logits = jax.random.normal(k1, (2, 4, 16, 16), dtype=jnp.float32)
    labels = jax.random.bernoulli(k2, 0.5, (2, 4, 16, 16)).astype(jnp.float32)

    loss_fn = jax.jit(lambda lg, lb: ohem_ce_loss(lg, lb, thresh=0.7, greater=True))
    out = jax.block_until_ready(loss_fn(logits, labels))

    ref = _reference(logits, labels, thresh=0.7, greater=True)
    assert jnp.allclose(out, ref, rtol=1e-5, atol=1e-5), (out, ref)

    print("KERNEL_OK")
</pallas_src>

<mosaic_0001>
module attributes {stable_mosaic.version = 11 : i64} {
  func.func @_ohem_kernel(%arg0: i32, %arg1: memref<8x512xf32, #tpu.memory_space<vmem>>, %arg2: memref<8x512xf32, #tpu.memory_space<vmem>>, %arg3: memref<8x512xf32, #tpu.memory_space<vmem>>, %arg4: memref<8x512xf32, #tpu.memory_space<vmem>>) attributes {dimension_semantics = [#tpu.dimension_semantics<arbitrary>], iteration_bounds = array<i64: 1>, scalar_prefetch = 0 : i64, scratch_operands = 0 : i64, tpu.core_type = #tpu.core_type<tc>, window_params = [{transform_indices = @transform_0, window_bounds = array<i64: 8, 512>}, {transform_indices = @transform_1, window_bounds = array<i64: 8, 512>}, {pipeline_mode = #tpu.pipeline_mode<synchronous>, transform_indices = @transform_2, window_bounds = array<i64: 8, 512>}, {pipeline_mode = #tpu.pipeline_mode<synchronous>, transform_indices = @transform_3, window_bounds = array<i64: 8, 512>}]} {
    %c0_i32 = arith.constant 0 : i32
    %0 = arith.cmpi eq, %arg0, %c0_i32 : i32
    %1 = arith.extui %0 : i1 to i32
    %c0_i32_0 = arith.constant 0 : i32
    %2 = arith.cmpi ne, %1, %c0_i32_0 : i32
    scf.if %2 {
      %cst_8 = arith.constant 0.000000e+00 : f32
      %20 = vector.broadcast %cst_8 : f32 to vector<8x512xf32>
      %c0_9 = arith.constant 0 : index
      %c0_10 = arith.constant 0 : index
      %21 = vector.load %arg3[%c0_9, %c0_10] : memref<8x512xf32, #tpu.memory_space<vmem>>, vector<8x512xf32>
      tpu.vector_store %arg3[%c0_9, %c0_10], %20 {strides = array<i32>} : memref<8x512xf32, #tpu.memory_space<vmem>>, vector<8x512xf32>,
      %cst_11 = arith.constant 0.000000e+00 : f32
      %22 = vector.broadcast %cst_11 : f32 to vector<8x512xf32>
      %c0_12 = arith.constant 0 : index
      %c0_13 = arith.constant 0 : index
      %23 = vector.load %arg4[%c0_12, %c0_13] : memref<8x512xf32, #tpu.memory_space<vmem>>, vector<8x512xf32>
      tpu.vector_store %arg4[%c0_12, %c0_13], %22 {strides = array<i32>} : memref<8x512xf32, #tpu.memory_space<vmem>>, vector<8x512xf32>,
    } else {
    }
    %c0 = arith.constant 0 : index
    %c0_1 = arith.constant 0 : index
    %3 = vector.load %arg1[%c0, %c0_1] : memref<8x512xf32, #tpu.memory_space<vmem>>, vector<8x512xf32>
    %c0_2 = arith.constant 0 : index
    %c0_3 = arith.constant 0 : index
    %4 = vector.load %arg2[%c0_2, %c0_3] : memref<8x512xf32, #tpu.memory_space<vmem>>, vector<8x512xf32>
    %cst = arith.constant 0.000000e+00 : f32
    %5 = vector.broadcast %cst : f32 to vector<8x512xf32>
    %6 = arith.maximumf %3, %5 : vector<8x512xf32>
    %7 = arith.mulf %3, %4 : vector<8x512xf32>
    %8 = arith.subf %6, %7 : vector<8x512xf32>
    %9 = math.absf %3 : vector<8x512xf32>
    %cst_4 = arith.constant 0.000000e+00 : f32
    %10 = vector.broadcast %cst_4 : f32 to vector<8x512xf32>
    %11 = arith.subf %10, %9 : vector<8x512xf32>
    %12 = math.exp %11 : vector<8x512xf32>
    %13 = math.log1p %12 : vector<8x512xf32>
    %14 = arith.addf %8, %13 : vector<8x512xf32>
    %cst_5 = arith.constant 0.356674939 : f32
    %15 = vector.broadcast %cst_5 : f32 to vector<8x512xf32>
    %16 = arith.cmpf ogt, %14, %15 : vector<8x512xf32>
    %c0_i32_6 = arith.constant 0 : i32
    %17 = arith.cmpi eq, %arg0, %c0_i32_6 : i32
    %18 = arith.extui %17 : i1 to i32
    %c0_i32_7 = arith.constant 0 : i32
    %19 = arith.cmpi ne, %18, %c0_i32_7 : i32
    scf.if %19 {
      %20 = tpu.iota {dimensions = array<i32: 0>} : vector<8x512xi32>
      %21 = tpu.iota {dimensions = array<i32: 1>} : vector<8x512xi32>
      %c4_i32 = arith.constant 4 : i32
      %22 = vector.broadcast %c4_i32 : i32 to vector<8x512xi32>
      %23 = arith.cmpi slt, %20, %22 : vector<8x512xi32>
      %c4_i32_8 = arith.constant 4 : i32
      %24 = vector.broadcast %c4_i32_8 : i32 to vector<8x512xi32>
      %25 = arith.cmpi eq, %20, %24 : vector<8x512xi32>
      %c0_i32_9 = arith.constant 0 : i32
      %26 = vector.broadcast %c0_i32_9 : i32 to vector<8x512xi32>
      %27 = arith.cmpi slt, %21, %26 : vector<8x512xi32>
      %28 = arith.andi %25, %27 : vector<8x512xi1>
      %29 = arith.ori %23, %28 : vector<8x512xi1>
      %30 = arith.andi %16, %29 : vector<8x512xi1>
      %cst_10 = arith.constant 0.000000e+00 : f32
      %31 = vector.broadcast %cst_10 : f32 to vector<8x512xf32>
      %32 = arith.select %30, %14, %31 : vector<8x512xi1>, vector<8x512xf32>
      %33 = arith.extui %30 : vector<8x512xi1> to vector<8x512xi32>
      %34 = arith.sitofp %33 : vector<8x512xi32> to vector<8x512xf32>
      %c0_11 = arith.constant 0 : index
      %c0_12 = arith.constant 0 : index
      %35 = vector.load %arg3[%c0_11, %c0_12] : memref<8x512xf32, #tpu.memory_space<vmem>>, vector<8x512xf32>
      %36 = vector.shape_cast %32 : vector<8x512xf32> to vector<1x8x512xf32>
      %cst_13 = arith.constant dense<0.000000e+00> : vector<8x512xf32>
      %37 = vector.multi_reduction <add>, %36, %cst_13 [0] : vector<1x8x512xf32> to vector<8x512xf32>
      %38 = arith.addf %35, %37 : vector<8x512xf32>
      %c0_14 = arith.constant 0 : index
      %c0_15 = arith.constant 0 : index
      %39 = vector.load %arg3[%c0_14, %c0_15] : memref<8x512xf32, #tpu.memory_space<vmem>>, vector<8x512xf32>
      tpu.vector_store %arg3[%c0_14, %c0_15], %38 {strides = array<i32>} : memref<8x512xf32, #tpu.memory_space<vmem>>, vector<8x512xf32>,
      %c0_16 = arith.constant 0 : index
      %c0_17 = arith.constant 0 : index
      %40 = vector.load %arg4[%c0_16, %c0_17] : memref<8x512xf32, #tpu.memory_space<vmem>>, vector<8x512xf32>
      %41 = vector.shape_cast %34 : vector<8x512xf32> to vector<1x8x512xf32>
      %cst_18 = arith.constant dense<0.000000e+00> : vector<8x512xf32>
      %42 = vector.multi_reduction <add>, %41, %cst_18 [0] : vector<1x8x512xf32> to vector<8x512xf32>
      %43 = arith.addf %40, %42 : vector<8x512xf32>
      %c0_19 = arith.constant 0 : index
      %c0_20 = arith.constant 0 : index
      %44 = vector.load %arg4[%c0_19, %c0_20] : memref<8x512xf32, #tpu.memory_space<vmem>>, vector<8x512xf32>
      tpu.vector_store %arg4[%c0_19, %c0_20], %43 {strides = array<i32>} : memref<8x512xf32, #tpu.memory_space<vmem>>, vector<8x512xf32>,
    } else {
    }
    return
  }
  func.func @transform_0(%arg0: i32) -> (i32, i32) {
    %c0_i32 = arith.constant 0 : i32
    %c0_i32_0 = arith.constant 0 : i32
    return %arg0, %c0_i32 : i32, i32
  }
  func.func @transform_1(%arg0: i32) -> (i32, i32) {
    %c0_i32 = arith.constant 0 : i32
    %c0_i32_0 = arith.constant 0 : i32
    return %arg0, %c0_i32 : i32, i32
  }
  func.func @transform_2(%arg0: i32) -> (i32, i32) {
    %c0_i32 = arith.constant 0 : i32
    %c0_i32_0 = arith.constant 0 : i32
    %c0_i32_1 = arith.constant 0 : i32
    return %c0_i32, %c0_i32_0 : i32, i32
  }
  func.func @transform_3(%arg0: i32) -> (i32, i32) {
    %c0_i32 = arith.constant 0 : i32
    %c0_i32_0 = arith.constant 0 : i32
    %c0_i32_1 = arith.constant 0 : i32
    return %c0_i32, %c0_i32_0 : i32, i32
  }
}

</mosaic_0001>

<bundles_post_ra>
// kernel: _lambda_.1
= control target key start
LH: loop header
LB: loop body
LE: loop exit
PB: predicated region body
PF: predicated region fallthrough
CT: control target
= control target key end

     0   :  { %v108_v27 = vlaneseq  ;;  %s308_s0 = inlined_call_operand.vmem [shape: f32[8,512], index: 0, kind: input, shape index: {}]   ;;  %s309_s1 = inlined_call_operand.vmem [shape: f32[8,512], index: 1, kind: input, shape index: {}]   ;;  %s310_s2 = inlined_call_operand.vmem [shape: f32[8,512], index: 2, kind: output, shape index: {0}]   ;;  %s311_s3 = inlined_call_operand.vmem [shape: f32[8,512], index: 3, kind: output, shape index: {1}]  }
   0x1   :  { %v25_v0 = vld [vmem:[%s308_s0] sm:$0xff]  ;;  %v233_v1 = vld [vmem:[%s308_s0 + $0x8] sm:$0xff]  ;;  %v238_v3 = vld [vmem:[%s308_s0 + $0x10] sm:$0xff] }
   0x2   :  { %v45_v2 = vand.u32 2147483647, %v25_v0  ;;  %v46_v4 = vand.u32 2147483647, %v233_v1  ;;  %v244_v5 = vld [vmem:[%s308_s0 + $0x18] sm:$0xff]  ;;  %v29_v26 = vld [vmem:[%s309_s1] sm:$0xff] }
   0x3   :  { %v47_v8 = vand.u32 2147483647, %v238_v3  ;;  %v48_v10 = vand.u32 2147483647, %v244_v5  ;;  %v30_v28 = vld [vmem:[%s309_s1 + $0x8] sm:$0xff]  ;;  %v31_v31 = vld [vmem:[%s309_s1 + $0x10] sm:$0xff]  ;;  %v37_v34 = vmul.f32 %v29_v26, %v25_v0 }
   0x4   :  { %v49_v6 = vsub.f32 0.0, %v45_v2  ;;  %v50_v7 = vsub.f32 0.0, %v46_v4  ;;  %v33_v33 = vmax.f32 %v25_v0, 0.0  ;;  %v32_v37 = vld [vmem:[%s309_s1 + $0x18] sm:$0xff]  ;;  %v109_v38 = vshrl.u32 %v108_v27, 7 }
   0x5   :  { %v51_v12 = vsub.f32 0.0, %v47_v8  ;;  %v52_v13 = vsub.f32 0.0, %v48_v10  ;;  %v34_v39 = vmax.f32 %v233_v1, 0.0  ;;  %v38_v40 = vmul.f32 %v30_v28, %v233_v1 }
   0x6   :  { %v53_v9 = vmul.f32 1.442695, %v49_v6  ;;  %v55_v11 = vmul.f32 1.442695, %v50_v7  ;;  %v35_v42 = vmax.f32 %v238_v3, 0.0  ;;  %v39_v43 = vmul.f32 %v31_v31, %v238_v3 }
   0x7   :  { %v57_v14 = vmul.f32 1.442695, %v51_v12  ;;  %v59_v15 = vmul.f32 1.442695, %v52_v13  ;;  %v36_v45 = vmax.f32 %v244_v5, 0.0  ;;  %v40_v48 = vmul.f32 %v32_v37, %v244_v5 }
   0x8   :  { %190 = vpow2.f32 %v53_v9  ;;  %v41_v51 = vsub.f32 %v33_v33, %v37_v34  ;;  %v42_v57 = vsub.f32 %v34_v39, %v38_v40  ;;  %vm115_vm2 = vcmp.lt.s32.totalorder %v109_v38, 4 }
   0x9   :  { %192 = vpow2.f32 %v55_v11  ;;  %v43_v59 = vsub.f32 %v35_v42, %v39_v43  ;;  %v44_v63 = vsub.f32 %v36_v45, %v40_v48  ;;  %v206_v13 = vmov 0.0  }
   0xa   :  { %194 = vpow2.f32 %v57_v14 }
   0xb   :  { %196 = vpow2.f32 %v59_v15 }
  0x12   :  { %v191_v16 = vpop.eup %190 }
  0x13   :  { %v193_v17 = vpop.eup %192  ;;  %v61_v18 = vadd.f32 1.0, %v191_v16  ;;  %v64_v22 = vmul.f32 -0.5, %v191_v16  ;;  %v67_v35 = vand.u32 2147483647, %v191_v16 }
  0x14   :  { %v70_v19 = vadd.f32 1.0, %v193_v17  ;;  %v195_v20 = vpop.eup %194  ;;  %v73_v24 = vmul.f32 -0.5, %v193_v17  ;;  %v76_v41 = vand.u32 2147483647, %v193_v17 }
  0x15   :  { %198 = vlog2.f32 %v61_v18  ;;  %v197_v21 = vpop.eup %196  ;;  %v79_v23 = vadd.f32 1.0, %v195_v20  ;;  %v82_v29 = vmul.f32 -0.5, %v195_v20  ;;  %v65_v30 = vadd.f32 1.0, %v64_v22 }
  0x16   :  { %200 = vlog2.f32 %v70_v19  ;;  %v88_v25 = vadd.f32 1.0, %v197_v21  ;;  %v91_v32 = vmul.f32 -0.5, %v197_v21  ;;  %v74_v36 = vadd.f32 1.0, %v73_v24 }
  0x17   :  { %202 = vlog2.f32 %v79_v23  ;;  %v83_v44 = vadd.f32 1.0, %v82_v29  ;;  %v66_v46 = vmul.f32 %v191_v16, %v65_v30  ;;  %v85_v47 = vand.u32 2147483647, %v195_v20 }
  0x18   :  { %204 = vlog2.f32 %v88_v25  ;;  %v92_v49 = vadd.f32 1.0, %v91_v32  ;;  %vm266_vm0 = vcmp.lt.f32.partialorder %v67_v35, 0.0004427343  ;;  %v75_v53 = vmul.f32 %v193_v17, %v74_v36 }
  0x19   :  { %v94_v54 = vand.u32 2147483647, %v197_v21  ;;  %vm77_vm1 = vcmp.lt.f32.partialorder %v76_v41, 0.0004427343  ;;  %v84_v60 = vmul.f32 %v195_v20, %v83_v44  ;;  %vm86_vm3 = vcmp.lt.f32.partialorder %v85_v47, 0.0004427343 }
  0x1a   :  { %v93_v0 = vmul.f32 %v197_v21, %v92_v49 }
  0x1b   :  { %vm95_vm4 = vcmp.lt.f32.partialorder %v94_v54, 0.0004427343 }
  0x1f   :  { %v199_v50 = vpop.eup %198 }
  0x20   :  { %v201_v55 = vpop.eup %200  ;;  %v63_v56 = vmul.f32 0.6931472, %v199_v50 }
  0x21   :  { %v72_v58 = vmul.f32 0.6931472, %v201_v55  ;;  %v203_v61 = vpop.eup %202 }
  0x22   :  { %v69_v62 = vsel %vm266_vm0, %v66_v46, %v63_v56  ;;  %v205_v1 = vpop.eup %204  ;;  %v81_v4 = vmul.f32 0.6931472, %v203_v61 }
  0x23   :  { %v97_v2 = vadd.f32 %v69_v62, %v41_v51  ;;  %v78_v3 = vsel %vm77_vm1, %v75_v53, %v72_v58  ;;  %v90_v6 = vmul.f32 0.6931472, %v205_v1 }
  0x24   :  { %v98_v5 = vadd.f32 %v78_v3, %v42_v57  ;;  %v87_v7 = vsel %vm86_vm3, %v84_v60, %v81_v4 }
  0x25   :  { %vm101_vm5 = vcmp.gt.f32.partialorder %v97_v2, 0.35667494  ;;  %v99_v9 = vadd.f32 %v87_v7, %v43_v59  ;;  %v96_v10 = vsel %vm95_vm4, %v93_v0, %v90_v6 }
  0x26   :  { %vm273_vm6 = vmand %vm101_vm5, %vm115_vm2  ;;  %vm102_vm7 = vcmp.gt.f32.partialorder %v98_v5, 0.35667494  ;;  %v100_v12 = vadd.f32 %v96_v10, %v44_v63 }
  0x27   :  { %v133_v11 = vsel %vm273_vm6, %v97_v2, 0.0  ;;  %vm130_vm8 = vmand %vm102_vm7, %vm115_vm2  ;;  %v185_v14 = vsel %vm273_vm6, 1.0, %v206_v13  ;;  %vm103_vm9 = vcmp.gt.f32.partialorder %v99_v9, 0.35667494 }
  0x28   :  { %v134_v15 = vsel %vm130_vm8, %v98_v5, 0.0  ;;  %vm131_vm10 = vmand %vm103_vm9, %vm115_vm2  ;;  %vm104_vm11 = vcmp.gt.f32.partialorder %v100_v12, 0.35667494  ;;  %v186_v16 = vsel %vm130_vm8, 1.0, %v206_v13  ;;  %157 = vst [vmem:[%s310_s2] sm:$0xff] %v133_v11 }
  0x29   :  { %v135_v17 = vsel %vm131_vm10, %v99_v9, 0.0  ;;  %vm132_vm12 = vmand %vm104_vm11, %vm115_vm2  ;;  %173 = vst [vmem:[%s311_s3] sm:$0xff] %v185_v14  ;;  %v187_v18 = vsel %vm131_vm10, 1.0, %v206_v13 }
  0x2a   :  { %158 = vst [vmem:[%s310_s2 + $0x8] sm:$0xff] %v134_v15  ;;  %v136_v19 = vsel %vm132_vm12, %v100_v12, 0.0  ;;  %v188_v20 = vsel %vm132_vm12, 1.0, %v206_v13  ;;  %174 = vst [vmem:[%s311_s3 + $0x8] sm:$0xff] %v186_v16 }
  0x2b   :  { %159 = vst [vmem:[%s310_s2 + $0x10] sm:$0xff] %v135_v17  ;;  %175 = vst [vmem:[%s311_s3 + $0x10] sm:$0xff] %v187_v18 }
  0x2c   :  { %160 = vst [vmem:[%s310_s2 + $0x18] sm:$0xff] %v136_v19  ;;  %176 = vst [vmem:[%s311_s3 + $0x18] sm:$0xff] %v188_v20 }

</bundles_post_ra>
